<compile_context>
chip_gen: v7x
topology: tpu7x:2x2x1
jax: 0.10.0
libtpu: 0.0.40
codegen_flags: <defaults>
</compile_context>

<pallas_src>
import math
from functools import partial

import jax
import jax.numpy as jnp
from jax.experimental import pallas as pl
from jax.experimental.pallas import tpu as pltpu


def _round_up(x: int, m: int) -> int:
    return ((x + m - 1) // m) * m


def _choose_bm(b: int, bm_max: int) -> int:
    """Batch tile: multiple of 16 sublanes; >=2 grid steps when B is large
    enough so the 'parallel' axis shards across v7x's two TensorCores."""
    if b <= 16:
        return 16
    bm = _round_up((b + 1) // 2, 16)
    return max(16, min(bm, bm_max))


def _action_predictor_kernel(s_ref, sn_ref, w_ref, b_ref, out_ref):
    """out = ([s | sn] @ W_packed + bias)[:, :A]   (single bf16 MXU matmul)."""
    a = out_ref.shape[1]

    # In-kernel f32 -> bf16 cast (free filler under the input DMA).
    s = s_ref[...].astype(w_ref.dtype)       # (bm, E)
    sn = sn_ref[...].astype(w_ref.dtype)     # (bm, E)

    t = jnp.concatenate([s, sn], axis=1)     # (bm, 2E) — fused K axis
    acc = jnp.dot(t, w_ref[...], preferred_element_type=jnp.float32)  # (bm, 128)
    acc = acc + b_ref[...]                   # resident (1, 128) f32 bias

    out_ref[...] = acc[:, :a].astype(out_ref.dtype)   # narrow (bm, A) store


def pack_linear_params(weight, bias, *, lane: int = 128):
    """One-time packing of nn.Linear(2E, A) params (off the hot path).

    weight: (A, 2E) PyTorch layout; bias: (A,).
    Returns:
      w_packed: (2E, 128) bf16 with W.T in columns [0, A), zeros after.
      b_packed: (1, 128) f32 with bias in columns [0, A), zeros after.
    """
    weight = jnp.asarray(weight, jnp.float32)
    bias = jnp.asarray(bias, jnp.float32)
    a, k2 = weight.shape
    kp = _round_up(k2, 16)                   # 2E=64 already sublane aligned
    ap = _round_up(a, lane)
    w_packed = jnp.zeros((kp, ap), jnp.float32).at[:k2, :a].set(weight.T)
    b_packed = jnp.zeros((1, ap), jnp.float32).at[0, :a].set(bias)
    return w_packed.astype(jnp.bfloat16), b_packed


@partial(jax.jit, static_argnames=("action_dim", "bm_max"))
def action_predictor(s, sn, w_packed, b_packed, *, action_dim: int,
                     bm_max: int = 4096):
    """s, sn: (B, E) f32; packed params from pack_linear_params(); -> (B, A)."""
    b, e = s.shape
    kp, ap = w_packed.shape

    bm = _choose_bm(b, bm_max)
    grid = (pl.cdiv(b, bm),)

    out = pl.pallas_call(
        _action_predictor_kernel,
        out_shape=jax.ShapeDtypeStruct((b, action_dim), s.dtype),
        grid_spec=pltpu.PrefetchScalarGridSpec(
            num_scalar_prefetch=0,
            grid=grid,
            in_specs=[
                pl.BlockSpec((bm, e), lambda i: (i, 0)),     # s  (ragged-ok)
                pl.BlockSpec((bm, e), lambda i: (i, 0)),     # sn (ragged-ok)
                pl.BlockSpec((kp, ap), lambda i: (0, 0)),    # weight resident
                pl.BlockSpec((1, ap), lambda i: (0, 0)),     # bias resident
            ],
            out_specs=pl.BlockSpec((bm, action_dim), lambda i: (i, 0)),
        ),
        compiler_params=pltpu.CompilerParams(
            dimension_semantics=("parallel",),
        ),
    )(s, sn, w_packed, b_packed)

    return out


if __name__ == "__main__":
    # Small shapes consistent with the module: batch=2, embedding=32, action_dim=3.
    B, E, A = 2, 32, 3

    key = jax.random.PRNGKey(0)
    k_s, k_sn, k_w, k_b = jax.random.split(key, 4)

    s = jax.random.normal(k_s, (B, E), dtype=jnp.float32)
    sn = jax.random.normal(k_sn, (B, E), dtype=jnp.float32)

    # Deterministic init mirroring nn.Linear: U(-1/sqrt(in), 1/sqrt(in)).
    in_features = 2 * E
    bound = 1.0 / math.sqrt(in_features)
    weight = jax.random.uniform(k_w, (A, in_features), jnp.float32, -bound, bound)
    bias = jax.random.uniform(k_b, (A,), jnp.float32, -bound, bound)

    # One-time parameter packing (transpose + lane pad), hoisted off the hot path.
    w_packed, b_packed = pack_linear_params(weight, bias)

    out = action_predictor(s, sn, w_packed, b_packed, action_dim=A)
    out = jax.block_until_ready(out)

    # Cross-check against a plain f32 JAX reference of the PyTorch forward.
    ref = jnp.concatenate([s, sn], axis=1) @ weight.T + bias
    assert out.shape == (B, A)
    # bf16 weights/activations with f32 accumulation -> loosened tolerance.
    assert jnp.allclose(out, ref, atol=3e-2, rtol=3e-2), (out, ref)

    print("KERNEL_OK")
</pallas_src>

<mosaic_0001>
module attributes {stable_mosaic.version = 11 : i64} {
  func.func @_action_predictor_kernel(%arg0: i32, %arg1: memref<16x32xf32, #tpu.memory_space<vmem>>, %arg2: memref<16x32xf32, #tpu.memory_space<vmem>>, %arg3: memref<64x128xbf16, #tpu.memory_space<vmem>>, %arg4: memref<1x128xf32, #tpu.memory_space<vmem>>, %arg5: memref<16x3xf32, #tpu.memory_space<vmem>>) attributes {dimension_semantics = [#tpu.dimension_semantics<parallel>], iteration_bounds = array<i64: 1>, scalar_prefetch = 0 : i64, scratch_operands = 0 : i64, tpu.core_type = #tpu.core_type<tc>, window_params = [{transform_indices = @transform_0, window_bounds = array<i64: 16, 32>}, {transform_indices = @transform_1, window_bounds = array<i64: 16, 32>}, {pipeline_mode = #tpu.pipeline_mode<synchronous>, transform_indices = @transform_2, window_bounds = array<i64: 64, 128>}, {pipeline_mode = #tpu.pipeline_mode<synchronous>, transform_indices = @transform_3, window_bounds = array<i64: 1, 128>}, {transform_indices = @transform_4, window_bounds = array<i64: 16, 3>}]} {
    %c0 = arith.constant 0 : index
    %c0_0 = arith.constant 0 : index
    %0 = vector.load %arg1[%c0, %c0_0] : memref<16x32xf32, #tpu.memory_space<vmem>>, vector<16x32xf32>
    %1 = arith.truncf %0 : vector<16x32xf32> to vector<16x32xbf16>
    %c0_1 = arith.constant 0 : index
    %c0_2 = arith.constant 0 : index
    %2 = vector.load %arg2[%c0_1, %c0_2] : memref<16x32xf32, #tpu.memory_space<vmem>>, vector<16x32xf32>
    %3 = arith.truncf %2 : vector<16x32xf32> to vector<16x32xbf16>
    %4 = tpu.concatenate %1, %3 in 1 : vector<16x32xbf16>, vector<16x32xbf16> -> vector<16x64xbf16>
    %c0_3 = arith.constant 0 : index
    %c0_4 = arith.constant 0 : index
    %5 = vector.load %arg3[%c0_3, %c0_4] : memref<64x128xbf16, #tpu.memory_space<vmem>>, vector<64x128xbf16>
    %cst = arith.constant dense<0.000000e+00> : vector<16x128xf32>
    %6 = tpu.matmul %4, %5, %cst {dimension_numbers = #tpu.dot_dimension_numbers<[1], [0], [0], [1], [0, 0, 1, 1], [], []>} : vector<16x64xbf16>, vector<64x128xbf16>, vector<16x128xf32> -> vector<16x128xf32>
    %c0_5 = arith.constant 0 : index
    %c0_6 = arith.constant 0 : index
    %7 = vector.load %arg4[%c0_5, %c0_6] : memref<1x128xf32, #tpu.memory_space<vmem>>, vector<1x128xf32>
    %8 = vector.broadcast %7 : vector<1x128xf32> to vector<16x128xf32>
    %9 = arith.addf %6, %8 : vector<16x128xf32>
    %10 = vector.extract_strided_slice %9 {offsets = [0, 0], sizes = [16, 3], strides = [1, 1]} : vector<16x128xf32> to vector<16x3xf32>
    %c0_7 = arith.constant 0 : index
    %c0_8 = arith.constant 0 : index
    %11 = vector.load %arg5[%c0_7, %c0_8] : memref<16x3xf32, #tpu.memory_space<vmem>>, vector<16x3xf32>
    tpu.vector_store %arg5[%c0_7, %c0_8], %10 {strides = array<i32>} : memref<16x3xf32, #tpu.memory_space<vmem>>, vector<16x3xf32>,
    return
  }
  func.func @transform_0(%arg0: i32) -> (i32, i32) {
    %c0_i32 = arith.constant 0 : i32
    %c0_i32_0 = arith.constant 0 : i32
    return %arg0, %c0_i32 : i32, i32
  }
  func.func @transform_1(%arg0: i32) -> (i32, i32) {
    %c0_i32 = arith.constant 0 : i32
    %c0_i32_0 = arith.constant 0 : i32
    return %arg0, %c0_i32 : i32, i32
  }
  func.func @transform_2(%arg0: i32) -> (i32, i32) {
    %c0_i32 = arith.constant 0 : i32
    %c0_i32_0 = arith.constant 0 : i32
    %c0_i32_1 = arith.constant 0 : i32
    return %c0_i32, %c0_i32_0 : i32, i32
  }
  func.func @transform_3(%arg0: i32) -> (i32, i32) {
    %c0_i32 = arith.constant 0 : i32
    %c0_i32_0 = arith.constant 0 : i32
    %c0_i32_1 = arith.constant 0 : i32
    return %c0_i32, %c0_i32_0 : i32, i32
  }
  func.func @transform_4(%arg0: i32) -> (i32, i32) {
    %c0_i32 = arith.constant 0 : i32
    %c0_i32_0 = arith.constant 0 : i32
    return %arg0, %c0_i32 : i32, i32
  }
}

</mosaic_0001>

<bundles_post_ra>
// kernel: action_predictor.1
= control target key start
LH: loop header
LB: loop body
LE: loop exit
PB: predicated region body
PF: predicated region fallthrough
CT: control target
= control target key end

     0   :  { %9 = vsyncpa [#allocation3], 0  ;;  %s358_s0 = inlined_call_operand.hbm [shape: f32[2,32], index: 0, kind: input, shape index: {}]   ;;  %s359_s1 = inlined_call_operand.vmem [shape: f32[2,32], index: 1, kind: input, shape index: {}]   ;;  %s360_s2 = inlined_call_operand.hbm [shape: bf16[64,128], index: 2, kind: input, shape index: {}]   ;;  %s361_s3 = inlined_call_operand.vmem [shape: f32[1,128], index: 3, kind: input, shape index: {}]   ;;  %s362_s4 = inlined_call_operand.hbm [shape: f32[2,3], index: 4, kind: output, shape index: {}]  }
   0x1   :  { %10 = vsyncpa [#allocation6], 0 }
   0x2   :  { %11 = vsyncpa [#allocation4], 0 }
   0x3   :  { %16 = vsyncadd [#allocation3], 224  ;;  %s272_s15 = smov [#allocation2]   ;;  %s200_s19 = scalar_lea.hbm %s358_s0, 32 }
   0x4   :  { %s17_s16 = sshll.u32 %s272_s15, 4  ;;  %p201_p0 = scmp.ne.s32.totalorder %s358_s0, %s200_s19  ;;  %s18_s16 = int_to_ptr.vmem [resolvable:$true] %s17_s16 }
   0x5   :  { %p204_p1 = scmp.lt.u32.totalorder %s200_s19, %s358_s0 }
   0x7   :  { %p206_p2 = pnand %p204_p1, %p201_p0 }
   0x9   :  { %209 = shalt.err (!%p206_p2)
}
   0xa   :  { %s210_s24 = scalar_lea.vmem %s18_s16, 32  ;;  %s214_s25 = scalar_lea.vmem %s18_s16, 256 }
   0xb   :  { %p211_p3 = scmp.ne.s32.totalorder %s18_s16, %s210_s24  ;;  %p215_p4 = scmp.lt.s32.totalorder %s18_s16, %s18_s16 }
   0xc   :  { %p216_p5 = scmp.lt.s32.totalorder %s214_s25, %s210_s24 }
   0xe   :  { %p217_p6 = por %p216_p5, %p215_p4 }
  0x10   :  { %p218_p7 = pnand %p217_p6, %p211_p3 }
  0x12   :  { %221 = shalt.err (!%p218_p7)
}
  0x13   :  { %s273_s26 = smov 32   ;;  %s274_s27 = smov 2  }
  0x14   :  { %23 = dma.hbm_to_vmem [thread:$0]  %s358_s0, 32, %s18_s16, [#allocation3], %s273_s26, %s273_s26, %s274_s27  }
  0x15   :  { %s275_s30 = smov [#allocation5]   ;;  %s222_s8 = scalar_lea.hbm %s360_s2, 512 }
  0x16   :  { %s31_s5 = sshll.u32 %s275_s30, 4  ;;  %p223_p8 = scmp.ne.s32.totalorder %s360_s2, %s222_s8  ;;  %s32_s5 = int_to_ptr.vmem [resolvable:$true] %s31_s5 }
  0x17   :  { %p226_p9 = scmp.lt.u32.totalorder %s222_s8, %s360_s2 }
  0x19   :  { %p228_p10 = pnand %p226_p9, %p223_p8 }
  0x1b   :  { %231 = shalt.err (!%p228_p10)
}
  0x1c   :  { %s232_s13 = scalar_lea.vmem %s32_s5, 512  ;;  %p237_p12 = scmp.lt.s32.totalorder %s32_s5, %s32_s5 }
  0x1d   :  { %p233_p11 = scmp.ne.s32.totalorder %s32_s5, %s232_s13  ;;  %p238_p13 = scmp.lt.s32.totalorder %s232_s13, %s232_s13 }
  0x1f   :  { %p239_p0 = por %p238_p13, %p237_p12 }
  0x21   :  { %p240_p1 = pnand %p239_p0, %p233_p11 }
  0x23   :  { %243 = shalt.err (!%p240_p1)
}
  0x24   :  { %s276_s0 = smov 64   ;;  %s277_s14 = smov 4  }
  0x25   :  { %37 = dma.hbm_to_vmem [thread:$0]  %s360_s2, 512, %s32_s5, [#allocation6], %s276_s0, %s276_s0, %s277_s14  }
  0x26   :  { %266 = dma.done.wait [#allocation3], 256  }
  0x27   :  { %267 = vsyncadd [#allocation3], 4294967040 }
  0x28   :  { %268 = dma.done.wait [#allocation6], 512  }
  0x29   :  { %269 = vsyncadd [#allocation6], 4294966784  ;;  %v278_v0 = vmov 0.0   ;;  %vm279_vm0 = vmmov 0   ;;  %v50_v1 = vld [vmem:[%s359_s1] sm:$0xff]  ;;  %v51_v2 = vld [vmem:[%s359_s1 + $0x8] sm:$0xff] }
  0x2a   :  { %175 = vmatprep.subr.bf16.mxu0 %v278_v0  ;;  %183 = vmatprep.mubr.msk.bf16.mxu0 %vm279_vm0, %v278_v0  ;;  %v52_v3 = vpack.c.bf16 %v51_v2, %v50_v1  ;;  %v196_v4 = vld [vmem:[#allocation5] sm:$0xff]   ;;  %v197_v5 = vld [vmem:[#allocation5 + $0x8] sm:$0xff]   ;;  %v198_v6 = vld [vmem:[#allocation5 + $0x10] sm:$0xff]   ;;  %vm56_vm1 = vcmask 261120   ;;  %vm99_vm2 = vcmask 523264   ;;  %vm143_vm3 = vcmask 23552  }
  0x2b   :  { %176 = vmatpush3.bf16.msra.mxu0 %v196_v4  ;;  %v199_v7 = vld [vmem:[#allocation5 + $0x18] sm:$0xff]   ;;  %v47_v8 = vld [vmem:[#allocation2] sm:$0xff] }
  0x2c   :  { %54 = vrot.lane.b32.xlu0 %v52_v3, %s273_s26  ;;  %177 = vmatprep.subr.bf16.mxu0 %v278_v0  ;;  %v48_v9 = vld [vmem:[#allocation2 + $0x8] sm:$0xff]  ;;  %v164_v13 = vld [vmem:[%s361_s3] ss:$0 sm:$0xff] }
  0x2d   :  { %v49_v10 = vpack.c.bf16 %v48_v9, %v47_v8 }
  0x2f   :  { %178 = vmatpush3.bf16.msra.mxu0 %v197_v5 }
  0x30   :  { %179 = vmatprep.subr.bf16.mxu0 %v278_v0 }
  0x33   :  { %180 = vmatpush3.bf16.msra.mxu0 %v198_v6 }
  0x34   :  { %181 = vmatprep.subr.bf16.mxu0 %v278_v0 }
  0x37   :  { %182 = vmatpush3.bf16.msra.mxu0 %v199_v7 }
  0x9e   :  { %v55_v11 = vpop.permute.xlu0 %54 }
  0x9f   :  { %v59_v12 = vsel %vm56_vm1, %v49_v10, %v55_v11 }
  0xa0   :  { %184 = vmatmul.mubr.msk.bf16.vlgmr.msra.gmra.mrb[0].mxu0 %vm99_vm2, %v59_v12 }
 0x173   :  { %v136_v14 = vpop.f32.mrb[0].mxu0 }
 0x174   :  { %v137_v15 = vadd.f32 %v164_v13, %v136_v14  ;;  %v185_v16 = vpop.f32.mrb[1].mxu0 }
 0x175   :  { %v139_v17 = vpop.f32.mrb[2].mxu0 }
 0x176   :  { %144 = vst.msk [vmem:[#allocation7] sm:$0xff] %vm143_vm3, %v137_v15  ;;  %v140_v18 = vadd.f32 %v164_v13, %v139_v17  ;;  %v186_v19 = vpop.f32.mrb[3].mxu0 }
 0x178   :  { %145 = vst.msk [vmem:[#allocation7 + $0x8] sm:$0xff] %vm143_vm3, %v140_v18 }
 0x179   :  { %150 = vsyncadd [#allocation4], 224  ;;  %s280_s21 = smov [#allocation7]  }
 0x17a   :  { %s151_s22 = sshll.u32 %s280_s21, 4  ;;  %s152_s22 = int_to_ptr.vmem [resolvable:$true] %s151_s22 }
 0x17b   :  { %s244_s23 = scalar_lea.vmem %s152_s22, 32  ;;  %s248_s24 = scalar_lea.vmem %s152_s22, 256 }
 0x17c   :  { %p245_p2 = scmp.ne.s32.totalorder %s152_s22, %s244_s23  ;;  %p249_p3 = scmp.lt.s32.totalorder %s152_s22, %s152_s22 }
 0x17d   :  { %p250_p4 = scmp.lt.s32.totalorder %s248_s24, %s244_s23 }
 0x17f   :  { %p251_p5 = por %p250_p4, %p249_p3 }
 0x181   :  { %p252_p6 = pnand %p251_p5, %p245_p2 }
 0x183   :  { %255 = shalt.err (!%p252_p6)
}
 0x184   :  { %s256_s28 = scalar_lea.hbm %s362_s4, 32 }
 0x185   :  { %p257_p7 = scmp.ne.s32.totalorder %s362_s4, %s256_s28  ;;  %p260_p8 = scmp.lt.u32.totalorder %s256_s28, %s362_s4 }
 0x187   :  { %p262_p9 = pnand %p260_p8, %p257_p7 }
 0x189   :  { %265 = shalt.err (!%p262_p9)
}
 0x18a   :  { %157 = dma.vmem_to_hbm [thread:$0]  %s152_s22, 32, %s362_s4, [#allocation4], %s273_s26, %s273_s26, %s274_s27  }
 0x18b   :  { %270 = dma.done.wait [#allocation4], 256  }
 0x18c   :  { %271 = vsyncadd [#allocation4], 4294967040 }
 0x18d   :  { %161 = vsyncpa [#allocation3], 1 }
 0x18e   :  { %162 = vsyncpa [#allocation6], 1 }
 0x18f   :  { %163 = vsyncpa [#allocation4], 1 }

</bundles_post_ra>
